<compile_context>
chip_gen: v7x
topology: tpu7x:2x2x1
jax: 0.10.0
libtpu: 0.0.40
codegen_flags: <defaults>
</compile_context>

<pallas_src>
import jax
import jax.numpy as jnp
from jax.experimental import pallas as pl
from jax.experimental.pallas import tpu as pltpu


_VMEM_LIMIT_BYTES = 32 * 1024 * 1024          # scoped-VMEM limit: safe on v5e/v6e/v7x
_DEFAULT_PIPELINE_BUDGET = 24 * 1024 * 1024   # double-buffered x + out tile bytes


def _linear_kernel(x_ref, w_ref, b_ref, o_ref):
    # x_ref: (T, K)  VMEM activation tile (K = lane-packed feature width)
    # w_ref: (K, P)  VMEM weight column / block-diagonal weight
    # b_ref: (1, 1)  SMEM bias scalar
    # o_ref: (T, P)  VMEM output tile
    acc = jnp.dot(x_ref[...], w_ref[...], preferred_element_type=jnp.float32)  # MXU
    o_ref[...] = (acc + b_ref[0, 0]).astype(o_ref.dtype)


def _sublane_align(dtype) -> int:
    # 8 rows for 4-byte, 16 for 2-byte, 32 for 1-byte element types.
    return max(8, 32 // jnp.dtype(dtype).itemsize)


def simple_neuron_forward(x, weight, bias, *,
                          pipeline_budget_bytes=_DEFAULT_PIPELINE_BUDGET):
    """Forward of nn.Linear(input_size, 1).

    x:      (B, D)  activations
    weight: (1, D)  PyTorch nn.Linear weight layout
    bias:   (1,)
    returns (B, 1)
    """
    B, D = x.shape
    cdtype = x.dtype
    itemsize = jnp.dtype(cdtype).itemsize

    # Module is f32; for narrower activations the MXU still accumulates in f32.
    w_flat = weight.reshape(D).astype(cdtype)
    b2 = bias.reshape(1, 1).astype(jnp.float32)

    # ---- lane packing: view `pack` rows as one 128-lane row when possible.
    pack = 1
    if D <= 128 and 128 % D == 0 and B % (128 // D) == 0:
        pack = 128 // D

    if pack > 1:
        x_k = x.reshape(B // pack, pack * D)   # free metadata reshape (row-major)
        eye = jnp.eye(pack, dtype=cdtype)
        # Block-diagonal weight: W[j*D + d, j] = w[d]
        w_k = (eye[:, None, :] * w_flat[None, :, None]).reshape(pack * D, pack)
    else:
        x_k = x
        w_k = w_flat.reshape(D, 1)

    T, K = x_k.shape
    P = pack

    # ---- tile rows from the VMEM budget (account for lane padding in VMEM).
    lanes_x = pl.cdiv(K, 128) * 128
    lanes_o = pl.cdiv(P, 128) * 128
    bytes_per_row = (lanes_x + lanes_o) * itemsize      # x row + out row in VMEM
    tile_t = max(1, pipeline_budget_bytes // (2 * bytes_per_row))  # double-buffered
    if tile_t < T:
        align = _sublane_align(cdtype)
        tile_t = max(align, (tile_t // align) * align)
    else:
        tile_t = T                                       # single full block

    num_blocks = pl.cdiv(T, tile_t)

    out = pl.pallas_call(
        _linear_kernel,
        out_shape=jax.ShapeDtypeStruct((T, P), cdtype),
        grid_spec=pltpu.PrefetchScalarGridSpec(
            num_scalar_prefetch=0,
            grid=(num_blocks,),
            in_specs=[
                pl.BlockSpec((tile_t, K), lambda i: (i, 0)),          # x tile
                pl.BlockSpec((K, P), lambda i: (0, 0)),               # weight
                pl.BlockSpec(memory_space=pltpu.MemorySpace.SMEM),    # bias scalar
            ],
            out_specs=pl.BlockSpec((tile_t, P), lambda i: (i, 0)),
        ),
        compiler_params=pltpu.CompilerParams(
            dimension_semantics=("parallel",),
            vmem_limit_bytes=_VMEM_LIMIT_BYTES,
        ),
        cost_estimate=pl.CostEstimate(
            flops=2 * B * D,
            transcendentals=0,
            bytes_accessed=B * D * itemsize + B * itemsize + D * itemsize + 4,
        ),
    )(x_k, w_k, b2)

    return out.reshape(B, 1)


if __name__ == "__main__":
    # Small shapes implied by the module: batch=8, input_size=32.
    batch, input_size = 8, 32

    key = jax.random.PRNGKey(0)
    kx, kw, kb = jax.random.split(key, 3)

    x = jax.random.normal(kx, (batch, input_size), dtype=jnp.float32)

    # Deterministic params mimicking nn.Linear default init:
    # uniform(-1/sqrt(in_features), 1/sqrt(in_features)).
    bound = 1.0 / jnp.sqrt(jnp.float32(input_size))
    weight = jax.random.uniform(
        kw, (1, input_size), dtype=jnp.float32, minval=-bound, maxval=bound
    )
    bias = jax.random.uniform(
        kb, (1,), dtype=jnp.float32, minval=-bound, maxval=bound
    )

    # 1) Small packed case (pack=4, single block).
    out = jax.block_until_ready(simple_neuron_forward(x, weight, bias))
    ref = x @ weight.T + bias
    assert out.shape == (batch, 1)
    assert jnp.allclose(out, ref, atol=1e-5, rtol=1e-5)

    # 2) Packed multi-block with a ragged boundary block (tiny tile budget
    #    forces several grid steps; last block relies on edge masking).
    xb = jax.random.normal(kx, (1000, input_size), dtype=jnp.float32)
    out_b = jax.block_until_ready(
        simple_neuron_forward(xb, weight, bias, pipeline_budget_bytes=64 * 1024))
    ref_b = xb @ weight.T + bias
    assert out_b.shape == (1000, 1)
    assert jnp.allclose(out_b, ref_b, atol=1e-5, rtol=1e-5)

    # 3) Unpacked fallback (batch not a multiple of the packing factor),
    #    also multi-block with a ragged boundary.
    xc = jax.random.normal(kx, (1037, input_size), dtype=jnp.float32)
    out_c = jax.block_until_ready(
        simple_neuron_forward(xc, weight, bias, pipeline_budget_bytes=64 * 1024))
    ref_c = xc @ weight.T + bias
    assert out_c.shape == (1037, 1)
    assert jnp.allclose(out_c, ref_c, atol=1e-5, rtol=1e-5)

    print("KERNEL_OK")
</pallas_src>

<mosaic_0001>
module attributes {stable_mosaic.version = 11 : i64} {
  func.func @_linear_kernel(%arg0: i32, %arg1: memref<2x128xf32, #tpu.memory_space<vmem>>, %arg2: memref<128x4xf32, #tpu.memory_space<vmem>>, %arg3: memref<1x1xf32, #tpu.memory_space<smem>>, %arg4: memref<2x4xf32, #tpu.memory_space<vmem>>) attributes {dimension_semantics = [#tpu.dimension_semantics<parallel>], iteration_bounds = array<i64: 1>, scalar_prefetch = 0 : i64, scratch_operands = 0 : i64, tpu.core_type = #tpu.core_type<tc>, window_params = [{transform_indices = @transform_0, window_bounds = array<i64: 2, 128>}, {pipeline_mode = #tpu.pipeline_mode<synchronous>, transform_indices = @transform_1, window_bounds = array<i64: 128, 4>}, {transform_indices = @transform_2, window_bounds = array<i64: 1, 1>}, {transform_indices = @transform_3, window_bounds = array<i64: 2, 4>}]} {
    %c0 = arith.constant 0 : index
    %c0_0 = arith.constant 0 : index
    %0 = vector.load %arg1[%c0, %c0_0] : memref<2x128xf32, #tpu.memory_space<vmem>>, vector<2x128xf32>
    %c0_1 = arith.constant 0 : index
    %c0_2 = arith.constant 0 : index
    %1 = vector.load %arg2[%c0_1, %c0_2] : memref<128x4xf32, #tpu.memory_space<vmem>>, vector<128x4xf32>
    %cst = arith.constant dense<0.000000e+00> : vector<2x4xf32>
    %2 = tpu.matmul %0, %1, %cst {dimension_numbers = #tpu.dot_dimension_numbers<[1], [0], [0], [1], [0, 0, 1, 1], [], []>} : vector<2x128xf32>, vector<128x4xf32>, vector<2x4xf32> -> vector<2x4xf32>
    %c0_3 = arith.constant 0 : index
    %c0_4 = arith.constant 0 : index
    %3 = memref.load %arg3[%c0_3, %c0_4] : memref<1x1xf32, #tpu.memory_space<smem>>
    %4 = vector.broadcast %3 : f32 to vector<2x4xf32>
    %5 = arith.addf %2, %4 : vector<2x4xf32>
    %c0_5 = arith.constant 0 : index
    %c0_6 = arith.constant 0 : index
    %6 = vector.load %arg4[%c0_5, %c0_6] : memref<2x4xf32, #tpu.memory_space<vmem>>, vector<2x4xf32>
    tpu.vector_store %arg4[%c0_5, %c0_6], %5 {strides = array<i32>} : memref<2x4xf32, #tpu.memory_space<vmem>>, vector<2x4xf32>,
    return
  }
  func.func @transform_0(%arg0: i32) -> (i32, i32) {
    %c0_i32 = arith.constant 0 : i32
    %c0_i32_0 = arith.constant 0 : i32
    return %arg0, %c0_i32 : i32, i32
  }
  func.func @transform_1(%arg0: i32) -> (i32, i32) {
    %c0_i32 = arith.constant 0 : i32
    %c0_i32_0 = arith.constant 0 : i32
    %c0_i32_1 = arith.constant 0 : i32
    return %c0_i32, %c0_i32_0 : i32, i32
  }
  func.func @transform_2(%arg0: i32) -> (i32, i32) {
    %c0_i32 = arith.constant 0 : i32
    %c0_i32_0 = arith.constant 0 : i32
    %c0_i32_1 = arith.constant 0 : i32
    return %c0_i32, %c0_i32_0 : i32, i32
  }
  func.func @transform_3(%arg0: i32) -> (i32, i32) {
    %c0_i32 = arith.constant 0 : i32
    %c0_i32_0 = arith.constant 0 : i32
    return %arg0, %c0_i32 : i32, i32
  }
}

</mosaic_0001>

<bundles_post_ra>
// kernel: tpu_custom_call.1
= control target key start
LH: loop header
LB: loop body
LE: loop exit
PB: predicated region body
PF: predicated region fallthrough
CT: control target
= control target key end

     0   :  { %v225_v3 = vmov 0.0|0.0   ;;  %vm226_vm0 = vmmov 0   ;;  %v227_v6 = vmov 0.0   ;;  %s315_s0 = inlined_call_operand.vmem [shape: f32[2,128], index: 0, kind: input, shape index: {}]   ;;  %s316_s1 = inlined_call_operand.vmem [shape: f32[128,4], index: 1, kind: input, shape index: {}]   ;;  %s317_s2 = inlined_call_operand.<no memory space> [shape: f32[1,1], index: 2, kind: input, shape index: {}]   ;;  %s318_s3 = inlined_call_operand.hbm [shape: f32[2,4], index: 3, kind: output, shape index: {}]  }
   0x1   :  { %v17_v0 = vld [vmem:[%s316_s1] sm:$0xff]  ;;  %v18_v1 = vld [vmem:[%s316_s1 + $0x8] sm:$0xff]  ;;  %v19_v2 = vld [vmem:[%s316_s1 + $0x10] sm:$0xff]  ;;  %173 = vmatprep.subr.bf16.mxu0 %v225_v3  ;;  %170 = vmatprep.mubr.msk.f32.mxu0 %vm226_vm0, %v227_v6 }
   0x2   :  { %v174_v4 = vpack.c.bf16 %v18_v1, %v17_v0  ;;  %v20_v5 = vld [vmem:[%s316_s1 + $0x18] sm:$0xff]  ;;  %v21_v8 = vld [vmem:[%s316_s1 + $0x20] sm:$0xff]  ;;  %v22_v9 = vld [vmem:[%s316_s1 + $0x28] sm:$0xff] }
   0x3   :  { %v177_v7 = vpack.c.bf16 %v20_v5, %v19_v2 }
   0x4   :  { %175 = vmatpush3.bf16.msra.mxu0 %v174_v4 }
   0x5   :  { %176 = vmatprep.subr.bf16.mxu0 %v225_v3 }
   0x6   :  { %9 = vsyncpa [#allocation4], 0  ;;  %v180_v10 = vpack.c.bf16 %v22_v9, %v21_v8  ;;  %v23_v11 = vld [vmem:[%s316_s1 + $0x30] sm:$0xff]  ;;  %v24_v12 = vld [vmem:[%s316_s1 + $0x38] sm:$0xff]  ;;  %v34_v27 = vstv %s317_s2  ;;  %s228_s21 = smov [#allocation3]   ;;  %vm105_vm1 = vcmask 25600  }
   0x7   :  { %v183_v13 = vpack.c.bf16 %v24_v12, %v23_v11  ;;  %v25_v14 = vld [vmem:[%s316_s1 + $0x40] sm:$0xff]  ;;  %v26_v15 = vld [vmem:[%s316_s1 + $0x48] sm:$0xff]  ;;  %v27_v17 = vld [vmem:[%s316_s1 + $0x50] sm:$0xff]  ;;  %s113_s22 = sshll.u32 %s228_s21, 4  ;;  %s114_s22 = int_to_ptr.vmem [resolvable:$true] %s113_s22 }
   0x8   :  { %178 = vmatpush3.bf16.msra.mxu0 %v177_v7  ;;  %v186_v16 = vpack.c.bf16 %v26_v15, %v25_v14  ;;  %v28_v18 = vld [vmem:[%s316_s1 + $0x58] sm:$0xff]  ;;  %v29_v20 = vld [vmem:[%s316_s1 + $0x60] sm:$0xff]  ;;  %v30_v21 = vld [vmem:[%s316_s1 + $0x68] sm:$0xff]  ;;  %p206_p1 = scmp.lt.s32.totalorder %s114_s22, %s114_s22 }
   0x9   :  { %179 = vmatprep.subr.bf16.mxu0 %v225_v3  ;;  %v189_v19 = vpack.c.bf16 %v28_v18, %v27_v17  ;;  %v192_v22 = vpack.c.bf16 %v30_v21, %v29_v20  ;;  %v31_v23 = vld [vmem:[%s316_s1 + $0x70] sm:$0xff]  ;;  %v32_v24 = vld [vmem:[%s316_s1 + $0x78] sm:$0xff]  ;;  %v16_v26 = vld [vmem:[%s315_s0] sm:$0x3]  ;;  %s201_s1 = scalar_lea.vmem %s114_s22, 32 }
   0xa   :  { %v195_v25 = vpack.c.bf16 %v32_v24, %v31_v23  ;;  %p202_p0 = scmp.ne.s32.totalorder %s114_s22, %s201_s1  ;;  %p207_p2 = scmp.lt.s32.totalorder %s201_s1, %s201_s1 }
   0xc   :  { %181 = vmatpush3.bf16.msra.mxu0 %v180_v10  ;;  %p208_p3 = por %p207_p2, %p206_p1 }
   0xd   :  { %182 = vmatprep.subr.bf16.mxu0 %v225_v3 }
   0xe   :  { %p209_p4 = pnand %p208_p3, %p202_p0 }
  0x10   :  { %184 = vmatpush3.bf16.msra.mxu0 %v183_v13 }
  0x11   :  { %185 = vmatprep.subr.bf16.mxu0 %v225_v3 }
  0x14   :  { %187 = vmatpush3.bf16.msra.mxu0 %v186_v16 }
  0x15   :  { %188 = vmatprep.subr.bf16.mxu0 %v225_v3 }
  0x18   :  { %190 = vmatpush3.bf16.msra.mxu0 %v189_v19 }
  0x19   :  { %191 = vmatprep.subr.bf16.mxu0 %v225_v3 }
  0x1c   :  { %193 = vmatpush3.bf16.msra.mxu0 %v192_v22 }
  0x1d   :  { %194 = vmatprep.subr.bf16.mxu0 %v225_v3 }
  0x20   :  { %196 = vmatpush3.bf16.msra.mxu0 %v195_v25 }
  0x23   :  { %171 = vmatmul.mubr.f32.vlgmr.msra.gmra.mrb[0].mxu0 %v16_v26 }
  0xf6   :  { %v101_v28 = vpop.f32.mrb[0].mxu0 }
  0xf7   :  { %v102_v29 = vadd.f32 %v101_v28, %v34_v27  ;;  %v172_v30 = vpop.f32.mrb[1].mxu0 }
  0xf9   :  { %106 = vst.msk [vmem:[#allocation3] sm:$0x3] %vm105_vm1, %v102_v29 }
  0xfa   :  { %212 = shalt.err (!%p209_p4)
}
  0xfb   :  { %s213_s24 = scalar_lea.hbm %s318_s3, 32 }
  0xfc   :  { %p214_p5 = scmp.ne.s32.totalorder %s318_s3, %s213_s24  ;;  %p217_p6 = scmp.lt.u32.totalorder %s213_s24, %s318_s3 }
  0xfe   :  { %p219_p7 = pnand %p217_p6, %p214_p5 }
 0x100   :  { %222 = shalt.err (!%p219_p7)
}
 0x101   :  { %116 = dma.vmem_to_hbm [thread:$0]  %s114_s22, 32, %s318_s3, [#allocation4]  }
 0x102   :  { %223 = dma.done.wait [#allocation4], 32  }
 0x103   :  { %224 = vsyncadd [#allocation4], 4294967264 }
 0x104   :  { %120 = vsyncpa [#allocation4], 1 }

</bundles_post_ra>
